<compile_context>
chip_gen: v5e
topology: v5e:2x2
jax: 0.10.0
libtpu: 0.0.40
codegen_flags: <defaults>
</compile_context>

<pallas_src>
import functools

import jax
import jax.numpy as jnp
from jax.experimental import pallas as pl
from jax.experimental.pallas import tpu as pltpu


def _token_cat_bf_kernel(tok_ref, x_ref, o_ref, *, num):
    """Batch-first blocks: tok (num, D), x (tb, S, D), out (tb, num + S, D)."""
    tb = o_ref.shape[0]
    d = o_ref.shape[-1]
    tok = tok_ref[...].astype(o_ref.dtype)
    # Prepend the learnable tokens for every batch row in this tile.
    o_ref[:, :num, :] = jnp.broadcast_to(tok[None, :, :], (tb, num, d))
    # Copy the original sequence right after the tokens (native-dtype VMEM copy).
    o_ref[:, num:, :] = x_ref[...].astype(o_ref.dtype)


def _token_cat_sf_kernel(tok_ref, x_ref, o_ref, *, num):
    """Seq-first blocks: tok (num, D), x (S, B, D), out (num + S, B, D)."""
    s, b, d = x_ref.shape
    tok = tok_ref[...].astype(o_ref.dtype)
    o_ref[:num, :, :] = jnp.broadcast_to(tok[:, None, :], (num, b, d))
    o_ref[num:, :, :] = x_ref[...].astype(o_ref.dtype)


@functools.partial(jax.jit, static_argnames=("batch_first", "tb"))
def token_forward(x, token, *, batch_first=True, tb=8):
    """Pallas implementation of Token.forward.

    batch_first=True : x (B, S, D) -> (B, num + S, D)
    batch_first=False: x (S, B, D) -> (num + S, B, D)
    """
    num, d = token.shape
    # Keep vmem headroom safe on every generation (v7x physical VMEM is 64 MiB).
    cparams_kwargs = dict(vmem_limit_bytes=48 * 1024 * 1024)

    if batch_first:
        b, s, d_x = x.shape
        assert d_x == d, "feature dim of x must match token dim"
        tb_eff = min(tb, b)  # static Python int at trace time
        grid = (pl.cdiv(b, tb_eff),)
        return pl.pallas_call(
            functools.partial(_token_cat_bf_kernel, num=num),
            out_shape=jax.ShapeDtypeStruct((b, num + s, d), x.dtype),
            grid_spec=pltpu.PrefetchScalarGridSpec(
                num_scalar_prefetch=0,
                grid=grid,
                in_specs=[
                    pl.BlockSpec((num, d), lambda i: (0, 0)),        # token (resident)
                    pl.BlockSpec((tb_eff, s, d), lambda i: (i, 0, 0)),  # x batch tile
                ],
                out_specs=pl.BlockSpec((tb_eff, num + s, d), lambda i: (i, 0, 0)),
            ),
            compiler_params=pltpu.CompilerParams(
                dimension_semantics=("parallel",),  # shard batch tiles across TCs (v7x)
                **cparams_kwargs,
            ),
        )(token, x)
    else:
        s, b, d_x = x.shape
        assert d_x == d, "feature dim of x must match token dim"
        # Small full-array copy kernel (single grid step). For very long sequences this
        # would be tiled along S with manual DMA; not needed at these sizes.
        return pl.pallas_call(
            functools.partial(_token_cat_sf_kernel, num=num),
            out_shape=jax.ShapeDtypeStruct((num + s, b, d), x.dtype),
            grid_spec=pltpu.PrefetchScalarGridSpec(
                num_scalar_prefetch=0,
                grid=(1,),
                in_specs=[
                    pl.BlockSpec((num, d), lambda i: (0, 0)),
                    pl.BlockSpec((s, b, d), lambda i: (0, 0, 0)),
                ],
                out_specs=pl.BlockSpec((num + s, b, d), lambda i: (0, 0, 0)),
            ),
            compiler_params=pltpu.CompilerParams(
                dimension_semantics=("arbitrary",),
                **cparams_kwargs,
            ),
        )(token, x)


def _reference_bf(x, token):
    b, _, d = x.shape
    num = token.shape[0]
    return jnp.concatenate([jnp.broadcast_to(token[None], (b, num, d)), x], axis=1)


def _reference_sf(x, token):
    _, b, d = x.shape
    num = token.shape[0]
    return jnp.concatenate([jnp.broadcast_to(token[:, None, :], (num, b, d)), x], axis=0)


if __name__ == "__main__":
    key = jax.random.PRNGKey(0)
    k_x, k_tok = jax.random.split(key)

    batch, seq, dim, num = 4, 8, 128, 2  # D multiple of 128 -> lane-dense blocks

    # --- batch-first ('B','SL','D'), module-default zero token -------------------------
    x_bf = jax.random.normal(k_x, (batch, seq, dim), jnp.float32)
    token_zero = jnp.zeros((num, dim), jnp.float32)  # reset_parameters(): zeros_

    out = jax.block_until_ready(token_forward(x_bf, token_zero, batch_first=True))
    ref = _reference_bf(x_bf, token_zero)
    assert out.shape == (batch, num + seq, dim)
    assert jnp.array_equal(out, ref), "mismatch vs reference (zero token, batch_first)"

    # --- batch-first with a nonzero (trained) token ------------------------------------
    token_rnd = 0.02 * jax.random.normal(k_tok, (num, dim), jnp.float32)
    out = jax.block_until_ready(token_forward(x_bf, token_rnd, batch_first=True))
    ref = _reference_bf(x_bf, token_rnd)
    assert jnp.array_equal(out, ref), "mismatch vs reference (random token, batch_first)"

    # --- seq-first ('SL','B','D') -------------------------------------------------------
    x_sf = jnp.transpose(x_bf, (1, 0, 2))
    out = jax.block_until_ready(token_forward(x_sf, token_rnd, batch_first=False))
    ref = _reference_sf(x_sf, token_rnd)
    assert out.shape == (num + seq, batch, dim)
    assert jnp.array_equal(out, ref), "mismatch vs reference (seq_first)"

    print("KERNEL_OK")
</pallas_src>

<mosaic_0001>
module attributes {stable_mosaic.version = 11 : i64} {
  func.func @_token_cat_bf_kernel(%arg0: i32, %arg1: memref<2x128xf32, #tpu.memory_space<vmem>>, %arg2: memref<4x8x128xf32, #tpu.memory_space<vmem>>, %arg3: memref<4x10x128xf32, #tpu.memory_space<vmem>>) attributes {dimension_semantics = [#tpu.dimension_semantics<parallel>], iteration_bounds = array<i64: 1>, scalar_prefetch = 0 : i64, scratch_operands = 0 : i64, tpu.core_type = #tpu.core_type<tc>, window_params = [{pipeline_mode = #tpu.pipeline_mode<synchronous>, transform_indices = @transform_0, window_bounds = array<i64: 2, 128>}, {transform_indices = @transform_1, window_bounds = array<i64: 4, 8, 128>}, {transform_indices = @transform_2, window_bounds = array<i64: 4, 10, 128>}]} {
    %c0 = arith.constant 0 : index
    %c0_0 = arith.constant 0 : index
    %0 = vector.load %arg1[%c0, %c0_0] : memref<2x128xf32, #tpu.memory_space<vmem>>, vector<2x128xf32>
    %1 = vector.shape_cast %0 : vector<2x128xf32> to vector<1x2x128xf32>
    %2 = vector.shape_cast %1 : vector<1x2x128xf32> to vector<1x2x128xf32>
    %3 = vector.broadcast %2 : vector<1x2x128xf32> to vector<4x2x128xf32>
    %c0_1 = arith.constant 0 : index
    %c0_2 = arith.constant 0 : index
    %c0_3 = arith.constant 0 : index
    %4 = vector.load %arg3[%c0_1, %c0_2, %c0_3] : memref<4x10x128xf32, #tpu.memory_space<vmem>>, vector<4x2x128xf32>
    tpu.vector_store %arg3[%c0_1, %c0_2, %c0_3], %3 {strides = array<i32>} : memref<4x10x128xf32, #tpu.memory_space<vmem>>, vector<4x2x128xf32>,
    %c0_4 = arith.constant 0 : index
    %c0_5 = arith.constant 0 : index
    %c0_6 = arith.constant 0 : index
    %5 = vector.load %arg2[%c0_4, %c0_5, %c0_6] : memref<4x8x128xf32, #tpu.memory_space<vmem>>, vector<4x8x128xf32>
    %c0_7 = arith.constant 0 : index
    %c2 = arith.constant 2 : index
    %c0_8 = arith.constant 0 : index
    %6 = vector.load %arg3[%c0_7, %c2, %c0_8] : memref<4x10x128xf32, #tpu.memory_space<vmem>>, vector<4x8x128xf32>
    tpu.vector_store %arg3[%c0_7, %c2, %c0_8], %5 {strides = array<i32>} : memref<4x10x128xf32, #tpu.memory_space<vmem>>, vector<4x8x128xf32>,
    return
  }
  func.func @transform_0(%arg0: i32) -> (i32, i32) {
    %c0_i32 = arith.constant 0 : i32
    %c0_i32_0 = arith.constant 0 : i32
    %c0_i32_1 = arith.constant 0 : i32
    return %c0_i32, %c0_i32_0 : i32, i32
  }
  func.func @transform_1(%arg0: i32) -> (i32, i32, i32) {
    %c0_i32 = arith.constant 0 : i32
    %c0_i32_0 = arith.constant 0 : i32
    %c0_i32_1 = arith.constant 0 : i32
    return %arg0, %c0_i32, %c0_i32_0 : i32, i32, i32
  }
  func.func @transform_2(%arg0: i32) -> (i32, i32, i32) {
    %c0_i32 = arith.constant 0 : i32
    %c0_i32_0 = arith.constant 0 : i32
    %c0_i32_1 = arith.constant 0 : i32
    return %arg0, %c0_i32, %c0_i32_0 : i32, i32, i32
  }
}

</mosaic_0001>

<bundles_post_ra>
// kernel: token_forward.1
= control target key start
LH: loop header
LB: loop body
LE: loop exit
PB: predicated region body
PF: predicated region fallthrough
CT: control target
= control target key end

     0   :  { %7 = vsyncpa [#allocation3], 0  ;;  %s165_s0 = inlined_call_operand.hbm [shape: f32[2,128], index: 0, kind: input, shape index: {}]   ;;  %s166_s1 = inlined_call_operand.hbm [shape: f32[4,8,128], index: 1, kind: input, shape index: {}]   ;;  %s167_s2 = inlined_call_operand.vmem [shape: f32[4,10,128], index: 2, kind: output, shape index: {}]  }
   0x1   :  { %s14_s11 = sshll.u32 %s165_s0, 4  ;;  %s15_s11 = int_to_ptr.hbm [resolvable:$true] %s14_s11 }
   0x2   :  { %8 = vsyncpa [#allocation5], 0  ;;  %s116_s12 = smov [#allocation2]   ;;  %s24_s16 = sshll.u32 %s166_s1, 4  ;;  %s25_s16 = int_to_ptr.hbm [resolvable:$true] %s24_s16 }
   0x3   :  { %s16_s13 = sshll.u32 %s116_s12, 4  ;;  %s117_s17 = smov [#allocation4]   ;;  %s17_s13 = int_to_ptr.vmem [resolvable:$true] %s16_s13 }
   0x4   :  { %19 = dma.hbm_to_vmem [thread:$0]  %s15_s11, 32, %s17_s13, [#allocation3]  }
   0x5   :  { %s26_s18 = sshll.u32 %s117_s17, 4  ;;  %s118_s19 = smov 128   ;;  %s27_s18 = int_to_ptr.vmem [resolvable:$true] %s26_s18 }
   0x6   :  { %s119_s20 = smov 8  }
   0x7   :  { %32 = dma.hbm_to_vmem [thread:$0]  %s25_s16, 512, %s27_s18, [#allocation5], %s118_s19, %s118_s19, %s119_s20  }
   0x8   :  { %112 = dma.done.wait [#allocation3], 32  }
   0x9   :  { %113 = vsyncadd [#allocation3], 4294967264 }
   0xa   :  { %114 = dma.done.wait [#allocation5], 512  }
   0xb   :  { %115 = vsyncadd [#allocation5], 4294966784  ;;  %v41_v0 = vld [vmem:[#allocation2] sm:$0x3]  ;;  %v46_v1 = vld [vmem:[#allocation4] sm:$0xff] }
   0xc   :  { %42 = vst [vmem:[%s167_s2] sm:$0x3] %v41_v0  ;;  %v47_v2 = vld [vmem:[#allocation4 + $0x8] sm:$0xff]  ;;  %v48_v3 = vld [vmem:[#allocation4 + $0x10] sm:$0xff]  ;;  %v49_v4 = vld [vmem:[#allocation4 + $0x18] sm:$0xff] }
   0xd   :  { %43 = vst [vmem:[%s167_s2 + $0x10] sm:$0x3] %v41_v0 }
   0xe   :  { %44 = vst [vmem:[%s167_s2 + $0x20] sm:$0x3] %v41_v0 }
   0xf   :  { %45 = vst [vmem:[%s167_s2 + $0x30] sm:$0x3] %v41_v0 }
  0x10   :  { %50 = vst [vmem:[%s167_s2 + $0x2] sm:$0xff] %v46_v1 }
  0x11   :  { %51 = vst [vmem:[%s167_s2 + $0x12] sm:$0xff] %v47_v2 }
  0x12   :  { %52 = vst [vmem:[%s167_s2 + $0x22] sm:$0xff] %v48_v3 }
  0x13   :  { %53 = vst [vmem:[%s167_s2 + $0x32] sm:$0xff] %v49_v4 }
  0x14   :  { %58 = vsyncpa [#allocation3], 1 }
  0x15   :  { %59 = vsyncpa [#allocation5], 1 }

</bundles_post_ra>
